<compile_context>
chip_gen: v7x
topology: tpu7x:2x2x1
jax: 0.10.0
libtpu: 0.0.40
codegen_flags: <defaults>
</compile_context>

<pallas_src>
import functools
import math

import jax
import jax.numpy as jnp
from jax.experimental import pallas as pl
from jax.experimental.pallas import tpu as pltpu


def _rfm_kernel(x_ref, w1_ref, b1_ref, w2_ref, wt_ref, bt_ref, o_ref, *,
                a_t, t_0, y0_is_one, y2_is_one):
    xp = x_ref[...]                                   # (TN, P*d)  packed input rows

    # hx pre-activation, already repeated to the full output width
    # (x-normalization + Mx->Mx*Mt expansion folded into w1/b1 on the host).
    z1 = jnp.dot(xp, w1_ref[...], preferred_element_type=jnp.float32) + b1_ref[...]
    y_x = jax.nn.sigmoid(z1)                          # (TN, L)

    # normalized time coordinate, replicated into every output slot
    # (w2 is a 0/a_t selector matrix; constant offset folded in here).
    t_axis = jnp.dot(xp, w2_ref[...],
                     preferred_element_type=jnp.float32) - (a_t * t_0)   # (TN, L)

    # ht: Linear(1 -> Mx*Mt) + Sigmoid, now purely elementwise on replicated t.
    y_rfm = jax.nn.sigmoid(t_axis * wt_ref[...] + bt_ref[...])           # (TN, L)

    # partition-of-unity weights on the time axis (elementwise, EUP/VPU).
    c0 = ((t_axis > -1.25) & (t_axis <= -0.75)).astype(jnp.float32)
    c1 = ((t_axis > -0.75) & (t_axis <= 0.75)).astype(jnp.float32)
    c2 = ((t_axis > 0.75) & (t_axis <= 1.25)).astype(jnp.float32)
    if y0_is_one and y2_is_one:
        y_pou = c0 + c1 + c2
    else:
        s = jnp.sin(2.0 * math.pi * t_axis)
        y0 = jnp.ones_like(t_axis) if y0_is_one else (1.0 + s) * 0.5
        y2 = jnp.ones_like(t_axis) if y2_is_one else (1.0 - s) * 0.5
        y_pou = c0 * y0 + c1 + c2 * y2

    o_ref[...] = (y_x * (y_pou * y_rfm)).astype(o_ref.dtype)


def local_mul_t_psib_rep_pallas(x, wx, bx, wt, bt, *,
                                space_features, Mx, Mt,
                                x_max, x_min, t_max, t_min, t0, t1,
                                row_tile=1024, out_dtype=jnp.float32):
    """x: (*batch, space_features + 1) -> (*batch, Mx * Mt).

    wx: (space_features, Mx)  (transposed vs. PyTorch Linear), bx: (Mx,)
    wt: (1, Mx * Mt), bt: (Mx * Mt,)
    out_dtype: set to jnp.bfloat16 to halve HBM write traffic if downstream tolerates it.
    """
    part = x.shape[:-1]
    xf = space_features
    d = xf + 1
    assert x.shape[-1] == d
    MxMt = Mx * Mt
    n = int(math.prod(part)) if part else 1

    a_x = 2.0 / (x_max - x_min)
    a_t = 2.0 / (t_max - t_min)
    x_0 = (x_max + x_min) / 2.0
    t_0 = (t_max + t_min) / 2.0

    # ---- lane packing: P logical rows per physical row so the output row is
    #      (at least) 128 lanes wide -> unmasked full-width vector stores.
    if MxMt < 128 and 128 % MxMt == 0:
        P = 128 // MxMt
    else:
        P = 1
    L = P * MxMt                                      # physical output row width

    f32 = jnp.float32
    wx_rep = jnp.repeat(wx.astype(f32), Mt, axis=1)               # (xf, MxMt), col c -> wx[:, c//Mt]
    bx_rep = jnp.repeat(bx.astype(f32).reshape(-1), Mt)           # (MxMt,)
    w_x_eff = a_x * wx_rep                                        # fold x-normalization
    b_x_eff = bx_rep - (a_x * x_0) * jnp.sum(wx_rep, axis=0)

    # block-diagonal weights over the P packed rows (built once on the host)
    wd = jnp.zeros((d, MxMt), f32).at[:xf, :].set(w_x_eff)        # time row contributes 0
    w1 = jnp.kron(jnp.eye(P, dtype=f32), wd)                      # (P*d, L)
    td = jnp.zeros((d, MxMt), f32).at[xf, :].set(a_t)             # selects (and scales) t
    w2 = jnp.kron(jnp.eye(P, dtype=f32), td)                      # (P*d, L)
    b1 = jnp.tile(b_x_eff, P).reshape(1, L)
    wt_t = jnp.tile(wt.astype(f32).reshape(1, MxMt), (1, P))      # (1, L)
    bt_t = jnp.tile(bt.astype(f32).reshape(1, MxMt), (1, P))      # (1, L)

    # ---- tiling: big row tiles, VMEM-budget capped, no over-padding of tiny inputs.
    n_phys = -(-n // P)
    rt = max(8, (int(row_tile) // 8) * 8)
    # keep the output block <= ~4 MiB so double-buffered blocks fit default scoped
    # VMEM on every generation (incl. v7x's smaller VMEM).
    rt = min(rt, max(8, ((4 * 1024 * 1024) // (L * 4)) // 8 * 8))
    rt = min(rt, max(8, -(-n_phys // 8) * 8))
    grid = -(-n_phys // rt)
    n_phys_pad = grid * rt
    n_pad = n_phys_pad * P

    x2 = x.reshape(n, d).astype(f32)
    if n_pad > n:
        x2 = jnp.concatenate([x2, jnp.zeros((n_pad - n, d), f32)], axis=0)
    xp = x2.reshape(n_phys_pad, P * d)

    kernel = functools.partial(
        _rfm_kernel, a_t=a_t, t_0=t_0,
        y0_is_one=(t_min == t0), y2_is_one=(t_max == t1))

    out = pl.pallas_call(
        kernel,
        out_shape=jax.ShapeDtypeStruct((n_phys_pad, L), out_dtype),
        grid_spec=pltpu.PrefetchScalarGridSpec(
            num_scalar_prefetch=0,
            grid=(grid,),
            in_specs=[
                pl.BlockSpec((rt, P * d), lambda i: (i, 0)),      # streamed input rows
                pl.BlockSpec((P * d, L), lambda i: (0, 0)),       # w1 (resident)
                pl.BlockSpec((1, L), lambda i: (0, 0)),           # b1
                pl.BlockSpec((P * d, L), lambda i: (0, 0)),       # w2 (t selector)
                pl.BlockSpec((1, L), lambda i: (0, 0)),           # wt (tiled)
                pl.BlockSpec((1, L), lambda i: (0, 0)),           # bt (tiled)
            ],
            out_specs=pl.BlockSpec((rt, L), lambda i: (i, 0)),
        ),
        compiler_params=pltpu.CompilerParams(
            dimension_semantics=("parallel",)),
    )(xp, w1, b1, w2, wt_t, bt_t)

    y = out.reshape(n_pad, MxMt)[:n]
    return y.reshape(*part, MxMt)


def _reference(x, wx, bx, wt, bt, *, space_features, Mx, Mt,
               x_max, x_min, t_max, t_min, t0, t1):
    """Pure-JAX port of the PyTorch forward, for verification."""
    a_x = 2.0 / (x_max - x_min)
    a_t = 2.0 / (t_max - t_min)
    x_0 = (x_max + x_min) / 2.0
    t_0 = (t_max + t_min) / 2.0
    part = x.shape[:-1]
    x_axis = a_x * (x[..., :space_features] - x_0)
    y_x = jax.nn.sigmoid(x_axis @ wx + bx)
    t_axis = a_t * (x[..., space_features:] - t_0)
    y_rfm = jax.nn.sigmoid(t_axis @ wt + bt)
    c0 = (t_axis > -1.25) & (t_axis <= -0.75)
    c1 = (t_axis > -0.75) & (t_axis <= 0.75)
    c2 = (t_axis > 0.75) & (t_axis <= 1.25)
    y0 = 1.0 if t_min == t0 else (1.0 + jnp.sin(2.0 * jnp.pi * t_axis)) / 2.0
    y2 = 1.0 if t_max == t1 else (1.0 - jnp.sin(2.0 * jnp.pi * t_axis)) / 2.0
    y_pou = c0 * y0 + c1 * 1.0 + c2 * y2
    y_t = y_pou * y_rfm
    y = y_x.reshape(*part, Mx, 1) * y_t.reshape(*part, Mx, Mt)
    return y.reshape(*part, Mx * Mt)


if __name__ == "__main__":
    # module hyper-parameters (small, forward-consistent)
    space_features = 3
    Mx, Mt = 8, 4
    x_min, x_max = -1.0, 1.0
    t_min, t_max = 0.0, 1.0
    t0, t1 = 0.25, 0.75          # t_min != t0 and t_max != t1 -> sin branches active
    cfg = dict(space_features=space_features, Mx=Mx, Mt=Mt,
               x_max=x_max, x_min=x_min, t_max=t_max, t_min=t_min,
               t0=t0, t1=t1)

    key = jax.random.PRNGKey(0)
    k1, k2, k3, k4, k5 = jax.random.split(key, 5)

    # deterministic parameter init (PyTorch-Linear-style uniform bounds), stored as (in, out)
    bnd_x = 1.0 / math.sqrt(space_features)
    wx = jax.random.uniform(k1, (space_features, Mx), jnp.float32, -bnd_x, bnd_x)
    bx = jax.random.uniform(k2, (Mx,), jnp.float32, -bnd_x, bnd_x)
    wt = jax.random.uniform(k3, (1, Mx * Mt), jnp.float32, -1.0, 1.0)
    bt = jax.random.uniform(k4, (Mx * Mt,), jnp.float32, -1.0, 1.0)

    # example input: batch=2, seq=8, last dim = space_features + 1 (space coords + time)
    batch, seq = 2, 8
    x_sp = jax.random.uniform(k5, (batch, seq, space_features), jnp.float32, x_min, x_max)
    x_t = jax.random.uniform(jax.random.fold_in(k5, 1), (batch, seq, 1), jnp.float32,
                             t_min, t_max)
    x = jnp.concatenate([x_sp, x_t], axis=-1)          # (2, 8, 4)

    y = local_mul_t_psib_rep_pallas(x, wx, bx, wt, bt, **cfg)
    y = jax.block_until_ready(y)

    y_ref = _reference(x, wx, bx, wt, bt, **cfg)
    assert y.shape == (batch, seq, Mx * Mt)
    assert jnp.allclose(y, y_ref, atol=1e-5, rtol=1e-5), "mismatch vs reference"

    print("KERNEL_OK")
</pallas_src>

<mosaic_0001>
module attributes {stable_mosaic.version = 11 : i64} {
  func.func @_rfm_kernel(%arg0: i32, %arg1: memref<8x16xf32, #tpu.memory_space<vmem>>, %arg2: memref<16x128xf32, #tpu.memory_space<vmem>>, %arg3: memref<1x128xf32, #tpu.memory_space<vmem>>, %arg4: memref<16x128xf32, #tpu.memory_space<vmem>>, %arg5: memref<1x128xf32, #tpu.memory_space<vmem>>, %arg6: memref<1x128xf32, #tpu.memory_space<vmem>>, %arg7: memref<8x128xf32, #tpu.memory_space<vmem>>) attributes {dimension_semantics = [#tpu.dimension_semantics<parallel>], iteration_bounds = array<i64: 1>, scalar_prefetch = 0 : i64, scratch_operands = 0 : i64, tpu.core_type = #tpu.core_type<tc>, window_params = [{transform_indices = @transform_0, window_bounds = array<i64: 8, 16>}, {pipeline_mode = #tpu.pipeline_mode<synchronous>, transform_indices = @transform_1, window_bounds = array<i64: 16, 128>}, {pipeline_mode = #tpu.pipeline_mode<synchronous>, transform_indices = @transform_2, window_bounds = array<i64: 1, 128>}, {pipeline_mode = #tpu.pipeline_mode<synchronous>, transform_indices = @transform_3, window_bounds = array<i64: 16, 128>}, {pipeline_mode = #tpu.pipeline_mode<synchronous>, transform_indices = @transform_4, window_bounds = array<i64: 1, 128>}, {pipeline_mode = #tpu.pipeline_mode<synchronous>, transform_indices = @transform_5, window_bounds = array<i64: 1, 128>}, {transform_indices = @transform_6, window_bounds = array<i64: 8, 128>}]} {
    %c0 = arith.constant 0 : index
    %c0_0 = arith.constant 0 : index
    %0 = vector.load %arg1[%c0, %c0_0] : memref<8x16xf32, #tpu.memory_space<vmem>>, vector<8x16xf32>
    %c0_1 = arith.constant 0 : index
    %c0_2 = arith.constant 0 : index
    %1 = vector.load %arg2[%c0_1, %c0_2] : memref<16x128xf32, #tpu.memory_space<vmem>>, vector<16x128xf32>
    %cst = arith.constant dense<0.000000e+00> : vector<8x128xf32>
    %2 = tpu.matmul %0, %1, %cst {dimension_numbers = #tpu.dot_dimension_numbers<[1], [0], [0], [1], [0, 0, 1, 1], [], []>} : vector<8x16xf32>, vector<16x128xf32>, vector<8x128xf32> -> vector<8x128xf32>
    %c0_3 = arith.constant 0 : index
    %c0_4 = arith.constant 0 : index
    %3 = vector.load %arg3[%c0_3, %c0_4] : memref<1x128xf32, #tpu.memory_space<vmem>>, vector<1x128xf32>
    %4 = vector.broadcast %3 : vector<1x128xf32> to vector<8x128xf32>
    %5 = arith.addf %2, %4 : vector<8x128xf32>
    %6 = arith.negf %5 : vector<8x128xf32>
    %7 = math.exp %6 : vector<8x128xf32>
    %cst_5 = arith.constant 1.000000e+00 : f32
    %8 = vector.broadcast %cst_5 : f32 to vector<8x128xf32>
    %9 = arith.addf %8, %7 : vector<8x128xf32>
    %10 = arith.divf %8, %9 : vector<8x128xf32>
    %c0_6 = arith.constant 0 : index
    %c0_7 = arith.constant 0 : index
    %11 = vector.load %arg4[%c0_6, %c0_7] : memref<16x128xf32, #tpu.memory_space<vmem>>, vector<16x128xf32>
    %cst_8 = arith.constant dense<0.000000e+00> : vector<8x128xf32>
    %12 = tpu.matmul %0, %11, %cst_8 {dimension_numbers = #tpu.dot_dimension_numbers<[1], [0], [0], [1], [0, 0, 1, 1], [], []>} : vector<8x16xf32>, vector<16x128xf32>, vector<8x128xf32> -> vector<8x128xf32>
    %cst_9 = arith.constant 1.000000e+00 : f32
    %13 = vector.broadcast %cst_9 : f32 to vector<8x128xf32>
    %14 = arith.subf %12, %13 : vector<8x128xf32>
    %c0_10 = arith.constant 0 : index
    %c0_11 = arith.constant 0 : index
    %15 = vector.load %arg5[%c0_10, %c0_11] : memref<1x128xf32, #tpu.memory_space<vmem>>, vector<1x128xf32>
    %16 = vector.broadcast %15 : vector<1x128xf32> to vector<8x128xf32>
    %17 = arith.mulf %14, %16 : vector<8x128xf32>
    %c0_12 = arith.constant 0 : index
    %c0_13 = arith.constant 0 : index
    %18 = vector.load %arg6[%c0_12, %c0_13] : memref<1x128xf32, #tpu.memory_space<vmem>>, vector<1x128xf32>
    %19 = vector.broadcast %18 : vector<1x128xf32> to vector<8x128xf32>
    %20 = arith.addf %17, %19 : vector<8x128xf32>
    %21 = arith.negf %20 : vector<8x128xf32>
    %22 = math.exp %21 : vector<8x128xf32>
    %cst_14 = arith.constant 1.000000e+00 : f32
    %23 = vector.broadcast %cst_14 : f32 to vector<8x128xf32>
    %24 = arith.addf %23, %22 : vector<8x128xf32>
    %25 = arith.divf %23, %24 : vector<8x128xf32>
    %cst_15 = arith.constant -1.250000e+00 : f32
    %26 = vector.broadcast %cst_15 : f32 to vector<8x128xf32>
    %27 = arith.cmpf ogt, %14, %26 : vector<8x128xf32>
    %cst_16 = arith.constant -7.500000e-01 : f32
    %28 = vector.broadcast %cst_16 : f32 to vector<8x128xf32>
    %29 = arith.cmpf ole, %14, %28 : vector<8x128xf32>
    %30 = arith.andi %27, %29 : vector<8x128xi1>
    %31 = arith.extui %30 : vector<8x128xi1> to vector<8x128xi32>
    %32 = arith.sitofp %31 : vector<8x128xi32> to vector<8x128xf32>
    %cst_17 = arith.constant -7.500000e-01 : f32
    %33 = vector.broadcast %cst_17 : f32 to vector<8x128xf32>
    %34 = arith.cmpf ogt, %14, %33 : vector<8x128xf32>
    %cst_18 = arith.constant 7.500000e-01 : f32
    %35 = vector.broadcast %cst_18 : f32 to vector<8x128xf32>
    %36 = arith.cmpf ole, %14, %35 : vector<8x128xf32>
    %37 = arith.andi %34, %36 : vector<8x128xi1>
    %38 = arith.extui %37 : vector<8x128xi1> to vector<8x128xi32>
    %39 = arith.sitofp %38 : vector<8x128xi32> to vector<8x128xf32>
    %cst_19 = arith.constant 7.500000e-01 : f32
    %40 = vector.broadcast %cst_19 : f32 to vector<8x128xf32>
    %41 = arith.cmpf ogt, %14, %40 : vector<8x128xf32>
    %cst_20 = arith.constant 1.250000e+00 : f32
    %42 = vector.broadcast %cst_20 : f32 to vector<8x128xf32>
    %43 = arith.cmpf ole, %14, %42 : vector<8x128xf32>
    %44 = arith.andi %41, %43 : vector<8x128xi1>
    %45 = arith.extui %44 : vector<8x128xi1> to vector<8x128xi32>
    %46 = arith.sitofp %45 : vector<8x128xi32> to vector<8x128xf32>
    %cst_21 = arith.constant 6.28318548 : f32
    %47 = vector.broadcast %cst_21 : f32 to vector<8x128xf32>
    %48 = arith.mulf %47, %14 : vector<8x128xf32>
    %49 = math.sin %48 : vector<8x128xf32>
    %cst_22 = arith.constant 1.000000e+00 : f32
    %50 = vector.broadcast %cst_22 : f32 to vector<8x128xf32>
    %51 = arith.addf %50, %49 : vector<8x128xf32>
    %cst_23 = arith.constant 5.000000e-01 : f32
    %52 = vector.broadcast %cst_23 : f32 to vector<8x128xf32>
    %53 = arith.mulf %51, %52 : vector<8x128xf32>
    %cst_24 = arith.constant 1.000000e+00 : f32
    %54 = vector.broadcast %cst_24 : f32 to vector<8x128xf32>
    %55 = arith.subf %54, %49 : vector<8x128xf32>
    %cst_25 = arith.constant 5.000000e-01 : f32
    %56 = vector.broadcast %cst_25 : f32 to vector<8x128xf32>
    %57 = arith.mulf %55, %56 : vector<8x128xf32>
    %58 = arith.mulf %32, %53 : vector<8x128xf32>
    %59 = arith.addf %58, %39 : vector<8x128xf32>
    %60 = arith.mulf %46, %57 : vector<8x128xf32>
    %61 = arith.addf %59, %60 : vector<8x128xf32>
    %62 = arith.mulf %61, %25 : vector<8x128xf32>
    %63 = arith.mulf %10, %62 : vector<8x128xf32>
    %c0_26 = arith.constant 0 : index
    %c0_27 = arith.constant 0 : index
    %64 = vector.load %arg7[%c0_26, %c0_27] : memref<8x128xf32, #tpu.memory_space<vmem>>, vector<8x128xf32>
    tpu.vector_store %arg7[%c0_26, %c0_27], %63 {strides = array<i32>} : memref<8x128xf32, #tpu.memory_space<vmem>>, vector<8x128xf32>,
    return
  }
  func.func @transform_0(%arg0: i32) -> (i32, i32) {
    %c0_i32 = arith.constant 0 : i32
    %c0_i32_0 = arith.constant 0 : i32
    return %arg0, %c0_i32 : i32, i32
  }
  func.func @transform_1(%arg0: i32) -> (i32, i32) {
    %c0_i32 = arith.constant 0 : i32
    %c0_i32_0 = arith.constant 0 : i32
    %c0_i32_1 = arith.constant 0 : i32
    return %c0_i32, %c0_i32_0 : i32, i32
  }
  func.func @transform_2(%arg0: i32) -> (i32, i32) {
    %c0_i32 = arith.constant 0 : i32
    %c0_i32_0 = arith.constant 0 : i32
    %c0_i32_1 = arith.constant 0 : i32
    return %c0_i32, %c0_i32_0 : i32, i32
  }
  func.func @transform_3(%arg0: i32) -> (i32, i32) {
    %c0_i32 = arith.constant 0 : i32
    %c0_i32_0 = arith.constant 0 : i32
    %c0_i32_1 = arith.constant 0 : i32
    return %c0_i32, %c0_i32_0 : i32, i32
  }
  func.func @transform_4(%arg0: i32) -> (i32, i32) {
    %c0_i32 = arith.constant 0 : i32
    %c0_i32_0 = arith.constant 0 : i32
    %c0_i32_1 = arith.constant 0 : i32
    return %c0_i32, %c0_i32_0 : i32, i32
  }
  func.func @transform_5(%arg0: i32) -> (i32, i32) {
    %c0_i32 = arith.constant 0 : i32
    %c0_i32_0 = arith.constant 0 : i32
    %c0_i32_1 = arith.constant 0 : i32
    return %c0_i32, %c0_i32_0 : i32, i32
  }
  func.func @transform_6(%arg0: i32) -> (i32, i32) {
    %c0_i32 = arith.constant 0 : i32
    %c0_i32_0 = arith.constant 0 : i32
    return %arg0, %c0_i32 : i32, i32
  }
}

</mosaic_0001>

<bundles_post_ra>
// kernel: tpu_custom_call.1
= control target key start
LH: loop header
LB: loop body
LE: loop exit
PB: predicated region body
PF: predicated region fallthrough
CT: control target
= control target key end

     0   :  { %11 = vsyncpa [#allocation3], 0  ;;  %s715_s0 = inlined_call_operand.hbm [shape: f32[8,16], index: 0, kind: input, shape index: {}]   ;;  %s716_s1 = inlined_call_operand.hbm [shape: f32[16,128], index: 1, kind: input, shape index: {}]   ;;  %s717_s2 = inlined_call_operand.vmem [shape: f32[1,128], index: 2, kind: input, shape index: {}]   ;;  %s718_s3 = inlined_call_operand.hbm [shape: f32[16,128], index: 3, kind: input, shape index: {}]   ;;  %s719_s4 = inlined_call_operand.vmem [shape: f32[1,128], index: 4, kind: input, shape index: {}]   ;;  %s720_s5 = inlined_call_operand.vmem [shape: f32[1,128], index: 5, kind: input, shape index: {}]   ;;  %s721_s6 = inlined_call_operand.hbm [shape: f32[8,128], index: 6, kind: output, shape index: {}]  }
   0x1   :  { %12 = vsyncpa [#allocation6], 0 }
   0x2   :  { %13 = vsyncpa [#allocation4], 0  ;;  %s561_s21 = smov [#allocation5]   ;;  %s467_s25 = scalar_lea.hbm %s716_s1, 256 }
   0x3   :  { %s29_s22 = sshll.u32 %s561_s21, 4  ;;  %p468_p0 = scmp.ne.s32.totalorder %s716_s1, %s467_s25  ;;  %s30_s22 = int_to_ptr.vmem [resolvable:$true] %s29_s22 }
   0x4   :  { %p471_p1 = scmp.lt.u32.totalorder %s467_s25, %s716_s1 }
   0x6   :  { %p473_p2 = pnand %p471_p1, %p468_p0 }
   0x8   :  { %476 = shalt.err (!%p473_p2)
}
   0x9   :  { %s477_s30 = scalar_lea.vmem %s30_s22, 256  ;;  %p482_p4 = scmp.lt.s32.totalorder %s30_s22, %s30_s22 }
   0xa   :  { %p478_p3 = scmp.ne.s32.totalorder %s30_s22, %s477_s30  ;;  %p483_p5 = scmp.lt.s32.totalorder %s477_s30, %s477_s30 }
   0xc   :  { %p484_p6 = por %p483_p5, %p482_p4 }
   0xe   :  { %p485_p7 = pnand %p484_p6, %p478_p3 }
  0x10   :  { %488 = shalt.err (!%p485_p7)
}
  0x11   :  { %s562_s7 = smov 128   ;;  %s563_s8 = smov 8  }
  0x12   :  { %35 = dma.hbm_to_vmem [thread:$0]  %s716_s1, 256, %s30_s22, [#allocation6], %s562_s7, %s562_s7, %s563_s8  }
  0x13   :  { %s564_s11 = smov [#allocation2]   ;;  %s565_s13 = smov [#allocation7]  }
  0x14   :  { %s20_s12 = sshll.u32 %s564_s11, 4  ;;  %s43_s14 = sshll.u32 %s565_s13, 4  ;;  %s21_s12 = int_to_ptr.vmem [resolvable:$true] %s20_s12  ;;  %s44_s14 = int_to_ptr.vmem [resolvable:$true] %s43_s14 }
  0x15   :  { %s489_s17 = scalar_lea.hbm %s715_s0, 128 }
  0x16   :  { %p490_p8 = scmp.ne.s32.totalorder %s715_s0, %s489_s17  ;;  %p493_p9 = scmp.lt.u32.totalorder %s489_s17, %s715_s0 }
  0x18   :  { %p495_p10 = pnand %p493_p9, %p490_p8 }
  0x1a   :  { %498 = shalt.err (!%p495_p10)
}
  0x1b   :  { %s499_s1 = scalar_lea.vmem %s21_s12, 128  ;;  %p504_p12 = scmp.lt.s32.totalorder %s21_s12, %s21_s12 }
  0x1c   :  { %p500_p11 = scmp.ne.s32.totalorder %s21_s12, %s499_s1  ;;  %p505_p13 = scmp.lt.s32.totalorder %s499_s1, %s499_s1 }
  0x1e   :  { %p506_p0 = por %p505_p13, %p504_p12 }
  0x20   :  { %p507_p1 = pnand %p506_p0, %p500_p11 }
  0x22   :  { %510 = shalt.err (!%p507_p1)
}
  0x23   :  { %23 = dma.hbm_to_vmem [thread:$0]  %s715_s0, 128, %s21_s12, [#allocation3]  }
  0x24   :  { %s511_s26 = scalar_lea.hbm %s718_s3, 256 }
  0x25   :  { %p512_p2 = scmp.ne.s32.totalorder %s718_s3, %s511_s26  ;;  %p515_p3 = scmp.lt.u32.totalorder %s511_s26, %s718_s3 }
  0x27   :  { %p517_p4 = pnand %p515_p3, %p512_p2 }
  0x29   :  { %520 = shalt.err (!%p517_p4)
}
  0x2a   :  { %s521_s9 = scalar_lea.vmem %s44_s14, 256  ;;  %p526_p6 = scmp.lt.s32.totalorder %s44_s14, %s44_s14 }
  0x2b   :  { %p522_p5 = scmp.ne.s32.totalorder %s44_s14, %s521_s9  ;;  %p527_p7 = scmp.lt.s32.totalorder %s521_s9, %s521_s9 }
  0x2d   :  { %p528_p8 = por %p527_p7, %p526_p6 }
  0x2f   :  { %p529_p9 = pnand %p528_p8, %p522_p5 }
  0x31   :  { %532 = shalt.err (!%p529_p9)
}
  0x32   :  { %49 = dma.hbm_to_vmem [thread:$0]  %s718_s3, 256, %s44_s14, [#allocation6], %s562_s7, %s562_s7, %s563_s8  }
  0x33   :  { %555 = dma.done.wait [#allocation3], 128  }
  0x34   :  { %556 = vsyncadd [#allocation3], 4294967168 }
  0x35   :  { %557 = dma.done.wait [#allocation6], 512  }
  0x36   :  { %558 = vsyncadd [#allocation6], 4294966784  ;;  %v566_v0 = vmov 0.0|0.0   ;;  %vm567_vm0 = vmmov 0   ;;  %v568_v1 = vmov 0.0   ;;  %v153_v2 = vld [vmem:[#allocation7] sm:$0xff] }
  0x37   :  { %433 = vmatprep.subr.bf16.mxu1 %v566_v0  ;;  %427 = vmatprep.mubr.msk.f32.mxu1 %vm567_vm0, %v568_v1  ;;  %v154_v3 = vld [vmem:[#allocation7 + $0x8] sm:$0xff]  ;;  %v64_v5 = vld [vmem:[#allocation5] sm:$0xff]  ;;  %v65_v6 = vld [vmem:[#allocation5 + $0x8] sm:$0xff]  ;;  %vm73_vm1 = vcmask 130048   ;;  %v569_v25 = vmov 683565275  }
  0x38   :  { %430 = vmatprep.subr.bf16.mxu0 %v566_v0  ;;  %420 = vmatprep.mubr.msk.f32.mxu0 %vm567_vm0, %v568_v1  ;;  %v434_v4 = vpack.c.bf16 %v154_v3, %v153_v2  ;;  %v431_v7 = vpack.c.bf16 %v65_v6, %v64_v5  ;;  %v63_v8 = vld [vmem:[#allocation2] sm:$0xff]  ;;  %v570_v27 = vmov 2475754826   ;;  %v571_v30 = vmov 2131351028  }
  0x39   :  { %v572_v33 = vmov 2102212464   ;;  %v573_v36 = vmov 920167782   ;;  %v574_v39 = vmov 1326507024  }
  0x3a   :  { %435 = vmatpush3.bf16.msra.mxu1 %v434_v4  ;;  %432 = vmatpush3.bf16.msra.mxu0 %v431_v7 }
  0x3d   :  { %428 = vmatmul.mubr.msk.f32.vlgmr.msra.gmra.mrb[0].mxu1 %vm73_vm1, %v63_v8  ;;  %421 = vmatmul.mubr.msk.f32.vlgmr.msra.gmra.mrb[0].mxu0 %vm73_vm1, %v63_v8 }
 0x110   :  { %v221_v9 = vpop.f32.mrb[0].mxu1  ;;  %v657_v12 = vpop.f32.mrb[0].mxu0 }
 0x111   :  { %v655_v10 = vadd.f32 -1.0, %v221_v9  ;;  %v429_v11 = vpop.f32.mrb[1].mxu1  ;;  %v422_v13 = vpop.f32.mrb[1].mxu0 }
 0x113   :  { %v660_v14 = vmul.f32 6.2831855, %v655_v10  ;;  %vm248_vm12 = vcmp.gt.f32.partialorder %v655_v10, -1.25  ;;  %vm249_vm14 = vcmp.le.f32.partialorder %v655_v10, -0.75  ;;  %vm253_vm15 = vcmp.gt.f32.partialorder %v655_v10, -0.75 }
 0x114   :  { %vm254_vm1 = vcmp.le.f32.partialorder %v655_v10, 0.75 }
 0x115   :  { %v267_v15 = vand.u32 2139095040, %v660_v14  ;;  %v264_v19 = vand.u32 2147483647, %v660_v14  ;;  %vm266_vm9 = vcmp.lt.s32.totalorder %v660_v14, 0 }
 0x117   :  { %v268_v16 = vshrl.u32 %v267_v15, 23  ;;  %v271_v22 = vand.u32 8388607, %v264_v19  ;;  %vm265_vm10 = vcmp.le.f32.partialorder %v264_v19, 0.7853982 }
 0x119   :  { %v406_v17 = vadd.s32 4294967169, %v268_v16  ;;  %v272_v41 = vor.u32 8388608, %v271_v22 }
 0x11b   :  { %v274_v18 = vadd.s32 1, %v406_v17  ;;  %v312_v55 = vshll.u32 %v272_v41, 8 }
 0x11d   :  { %vm275_vm2 = vcmp.gt.s32.totalorder %v274_v18, 0 }
 0x11e   :  { %v276_v20 = vsel %vm275_vm2, %v274_v18, 0  ;;  %v400_v18 = vld [vmem:[%s719_s4] ss:$0 sm:$0xff]  ;;  %vm356_vm2 = vweird.f32 %v660_v14 }
 0x11f   :  { %v278_v21 = vand.u32 31, %v276_v20  ;;  %v277_v24 = vshrl.u32 %v276_v20, 5 }
 0x121   :  { %v279_v23 = vsub.s32 32, %v278_v21  ;;  %v281_v26 = vshll.u32 %v569_v25, %v278_v21  ;;  %v284_v28 = vshll.u32 %v570_v27, %v278_v21  ;;  %v287_v32 = vshll.u32 %v571_v30, %v278_v21 }
 0x122   :  { %v290_v34 = vshll.u32 %v572_v33, %v278_v21  ;;  %v293_v38 = vshll.u32 %v573_v36, %v278_v21  ;;  %vm296_vm3 = vcmp.lt.s32.totalorder %v277_v24, 1  ;;  %vm298_vm4 = vcmp.lt.s32.totalorder %v277_v24, 3 }
 0x123   :  { %v282_v29 = vshrl.u32 %v570_v27, %v279_v23  ;;  %v285_v31 = vshrl.u32 %v571_v30, %v279_v23  ;;  %v288_v35 = vshrl.u32 %v572_v33, %v279_v23  ;;  %v291_v37 = vshrl.u32 %v573_v36, %v279_v23 }
 0x124   :  { %v294_v40 = vshrl.u32 %v574_v39, %v279_v23  ;;  %v280_v47 = vshrl.u32 %v569_v25, %v279_v23  ;;  %vm299_vm5 = vcmp.lt.s32.totalorder %v277_v24, 4  ;;  %vm297_vm6 = vcmp.lt.s32.totalorder %v277_v24, 2 }
 0x125   :  { %v283_v42 = vor.u32 %v282_v29, %v281_v26  ;;  %v286_v43 = vor.u32 %v285_v31, %v284_v28  ;;  %v289_v44 = vor.u32 %v288_v35, %v287_v32  ;;  %v292_v45 = vor.u32 %v291_v37, %v290_v34  ;;  %v395_v26 = vld [vmem:[%s717_s2] ss:$0 sm:$0xff]  ;;  %s575_s2 = smov [#allocation8]  }
 0x126   :  { %v295_v46 = vor.u32 %v294_v40, %v293_v38  ;;  %v233_v27 = vmul.f32 %v400_v18, %v655_v10  ;;  %v401_v28 = vld [vmem:[%s720_s5] ss:$0 sm:$0xff]  ;;  %v144_v31 = vadd.f32 %v395_v26, %v657_v12  ;;  %s385_s4 = sshll.u32 %s575_s2, 4  ;;  %s386_s4 = int_to_ptr.vmem [resolvable:$true] %s385_s4 }
 0x127   :  { %v304_v48 = vsel %vm296_vm3, %v283_v42, %v286_v43  ;;  %v301_v49 = vsel %vm299_vm5, %v289_v44, 2102212464  ;;  %v305_v50 = vsel %vm299_vm5, %v292_v45, 920167782  ;;  %v308_v51 = vsel %vm296_vm3, %v286_v43, %v289_v44  ;;  %s533_s5 = scalar_lea.vmem %s386_s4, 128  ;;  %p538_p11 = scmp.lt.s32.totalorder %s386_s4, %s386_s4 }
 0x128   :  { %v309_v52 = vsel %vm299_vm5, %v295_v46, 1326507024  ;;  %v306_v53 = vsel %vm298_vm4, %v289_v44, %v305_v50  ;;  %v300_v56 = vsel %vm296_vm3, %v280_v47, %v283_v42  ;;  %v302_v57 = vsel %vm298_vm4, %v286_v43, %v301_v49  ;;  %vm250_vm5 = vmand %vm248_vm12, %vm249_vm14  ;;  %p534_p10 = scmp.ne.s32.totalorder %s386_s4, %s533_s5  ;;  %p539_p12 = scmp.lt.s32.totalorder %s533_s5, %s533_s5 }
 0x129   :  { %v310_v54 = vsel %vm298_vm4, %v292_v45, %v309_v52  ;;  %v307_v58 = vsel %vm297_vm6, %v304_v48, %v306_v53  ;;  %v303_v0 = vsel %vm297_vm6, %v300_v56, %v302_v57  ;;  %v241_v33 = vadd.f32 %v401_v28, %v233_v27 }
 0x12a   :  { %v311_v59 = vsel %vm297_vm6, %v308_v51, %v310_v54  ;;  %v669_v62 = vmul.u32.u64.low %v312_v55, %v307_v58  ;;  %v670_v63 = vmul.u32.u64.high %v312_v55, %v307_v58, %v669_v62  ;;  %v319_v3 = vmul.u32 %v312_v55, %v303_v0  ;;  %vm255_vm6 = vmand %vm253_vm15, %vm254_vm1  ;;  %p540_p13 = por %p539_p12, %p538_p11 }
 0x12b   :  { %v666_v60 = vmul.u32.u64.low %v312_v55, %v311_v59  ;;  %v667_v61 = vmul.u32.u64.high %v312_v55, %v311_v59, %v666_v60  ;;  %v397_v36 = vmul.f32 -1.442695, %v144_v31  ;;  %v402_v39 = vmul.f32 -1.442695, %v241_v33 }
 0x12c   :  { %v322_v2 = vadd.s32 1, %v670_v63  ;;  %vm258_vm3 = vcmp.gt.f32.partialorder %v655_v10, 0.75  ;;  %vm259_vm4 = vcmp.le.f32.partialorder %v655_v10, 1.25  ;;  %p541_p0 = pnand %p540_p13, %p534_p10 }
 0x12d   :  { %vm321_vm7 = vc.u32 %v667_v61, %v669_v62  ;;  %v320_v20 = vadd.s32 %v669_v62, %v667_v61  ;;  %455 = vpow2.f32 %v397_v36  ;;  %v403_v61 = vsel %vm250_vm5, 1.0, %v568_v1 }
 0x12e   :  { %v323_v4 = vsel %vm321_vm7, %v322_v2, %v670_v63  ;;  %457 = vpow2.f32 %v402_v39  ;;  %vm260_vm7 = vmand %vm258_vm3, %vm259_vm4 }
 0x12f   :  { %v324_v5 = vadd.s32 %v323_v4, %v319_v3  ;;  %v405_v63 = vsel %vm260_vm7, 1.0, %v568_v1 }
 0x131   :  { %v325_v6 = vadd.s32 536870912, %v324_v5 }
 0x133   :  { %v326_v7 = vshrl.u32 %v325_v6, 30 }
 0x135   :  { %v327_v8 = vshll.u32 %v326_v7, 30  ;;  %v350_v38 = vsub.s32 4, %v326_v7 }
 0x137   :  { %v328_v9 = vsub.s32 %v324_v5, %v327_v8  ;;  %v351_v42 = vsel %vm266_vm9, %v350_v38, %v326_v7  ;;  %v456_v45 = vpop.eup %455 }
 0x138   :  { %v353_v43 = vsel %vm265_vm10, 0, %v351_v42  ;;  %v458_v47 = vpop.eup %457  ;;  %v150_v50 = vadd.f32 1.0, %v456_v45 }
 0x139   :  { %v330_v11 = vsub.s32 0, %v328_v9  ;;  %v357_v44 = vadd.s32 3, %v353_v43  ;;  %v245_v52 = vadd.f32 1.0, %v458_v47 }
 0x13b   :  { %v407_v13 = vmin.u32 %v330_v11, %v328_v9  ;;  %v358_v46 = vand.u32 3, %v357_v44 }
 0x13d   :  { %v332_v15 = vclz %v407_v13  ;;  %vm363_vm11 = vcmp.eq.s32.totalorder %v358_v46, 2  ;;  %vm360_vm13 = vcmp.eq.s32.totalorder %v358_v46, 0  ;;  %vm359_vm0 = vcmp.lt.s32.totalorder %v358_v46, 2 }
 0x13f   :  { %v408_v16 = vadd.s32 4294967294, %v332_v15 }
 0x141   :  { %vm409_vm8 = vcmp.lt.s32.totalorder %v408_v16, 0 }
 0x142   :  { %v335_v17 = vsel %vm409_vm8, 0, %v408_v16 }
 0x143   :  { %v336_v21 = vsub.s32 32, %v335_v17  ;;  %v340_v22 = vsub.s32 4294967266, %v335_v17  ;;  %v337_v23 = vshll.u32 %v328_v9, %v335_v17 }
 0x145   :  { %v338_v24 = vshrl.u32 %v320_v20, %v336_v21  ;;  %v341_v25 = vadd.s32 127, %v340_v22 }
 0x147   :  { %v339_v29 = vor.u32 %v338_v24, %v337_v23  ;;  %v342_v30 = vshll.u32 %v341_v25, 23 }
 0x149   :  { %v343_v32 = vor.u32 4788187, %v342_v30  ;;  %v346_v35 = vcvt.s32.f32 %v339_v29 }
 0x14b   :  { %v344_v34 = vand.u32 2147483647, %v343_v32 }
 0x14d   :  { %v347_v37 = vmul.f32 %v346_v35, %v344_v34 }
 0x14f   :  { %v348_v40 = vxor.u32 2147483648, %v347_v37 }
 0x151   :  { %v349_v41 = vsel %vm266_vm9, %v348_v40, %v347_v37 }
 0x152   :  { %v352_v12 = vsel %vm265_vm10, %v660_v14, %v349_v41  ;;  %v404_v14 = vsel %vm255_vm6, 1.0, %v568_v1 }
 0x153   :  { %459 = vcosq.f32 %v352_v12 }
 0x154   :  { %461 = vsinq.f32 %v352_v12 }
 0x155   :  { %463 = vrcp.f32 %v150_v50 }
 0x156   :  { %465 = vrcp.f32 %v245_v52 }
 0x15d   :  { %v460_v48 = vpop.eup %459 }
 0x15e   :  { %v462_v49 = vpop.eup %461  ;;  %v364_v51 = vxor.u32 2147483648, %v460_v48 }
 0x15f   :  { %v361_v53 = vxor.u32 2147483648, %v462_v49  ;;  %v464_v3 = vpop.eup %463 }
 0x160   :  { %v365_v19 = vsel %vm363_vm11, %v364_v51, %v462_v49  ;;  %v466_v5 = vpop.eup %465 }
 0x161   :  { %v362_v54 = vsel %vm360_vm13, %v460_v48, %v361_v53 }
 0x162   :  { %v366_v55 = vsel %vm359_vm0, %v362_v54, %v365_v19 }
 0x163   :  { %v367_v56 = vsel %vm356_vm2, nan, %v366_v55 }
 0x164   :  { %v368_v57 = vadd.f32 1.0, %v367_v56  ;;  %v370_v58 = vsub.f32 1.0, %v367_v56 }
 0x166   :  { %v369_v59 = vmul.f32 0.5, %v368_v57  ;;  %v371_v60 = vmul.f32 0.5, %v370_v58 }
 0x168   :  { %v372_v62 = vmul.f32 %v403_v61, %v369_v59  ;;  %v374_v2 = vmul.f32 %v405_v63, %v371_v60 }
 0x16a   :  { %v373_v0 = vadd.f32 %v404_v14, %v372_v62 }
 0x16c   :  { %v375_v4 = vadd.f32 %v374_v2, %v373_v0 }
 0x16e   :  { %v376_v10 = vmul.f32 %v466_v5, %v375_v4 }
 0x170   :  { %v377_v6 = vmul.f32 %v464_v3, %v376_v10 }
 0x172   :  { %378 = vst [vmem:[#allocation8] sm:$0xff] %v377_v6 }
 0x173   :  { %544 = shalt.err (!%p541_p0)
}
 0x174   :  { %s545_s16 = scalar_lea.hbm %s721_s6, 128 }
 0x175   :  { %p546_p1 = scmp.ne.s32.totalorder %s721_s6, %s545_s16  ;;  %p549_p2 = scmp.lt.u32.totalorder %s545_s16, %s721_s6 }
 0x177   :  { %p551_p3 = pnand %p549_p2, %p546_p1 }
 0x179   :  { %554 = shalt.err (!%p551_p3)
}
 0x17a   :  { %388 = dma.vmem_to_hbm [thread:$0]  %s386_s4, 128, %s721_s6, [#allocation4]  }
 0x17b   :  { %559 = dma.done.wait [#allocation4], 128  }
 0x17c   :  { %560 = vsyncadd [#allocation4], 4294967168 }
 0x17d   :  { %392 = vsyncpa [#allocation3], 1 }
 0x17e   :  { %393 = vsyncpa [#allocation6], 1 }
 0x17f   :  { %394 = vsyncpa [#allocation4], 1 }

</bundles_post_ra>
